<compile_context>
chip_gen: v7x
topology: tpu7x:2x2x1
jax: 0.10.0
libtpu: 0.0.40
codegen_flags: <defaults>
</compile_context>

<pallas_src>
import functools

import jax
import jax.numpy as jnp
from jax.experimental import pallas as pl
from jax.experimental.pallas import tpu as pltpu


def _round_up(x, m):
    return ((x + m - 1) // m) * m


def _linear_kernel(x_ref, w_ref, b_ref, o_ref, acc_ref):
    # grid = (M_tiles, N_tiles, K_tiles); K (contraction over in_features) last.
    k = pl.program_id(2)

    @pl.when(k == 0)
    def _init():
        acc_ref[...] = jnp.zeros_like(acc_ref)

    acc_ref[...] += jnp.dot(
        x_ref[...], w_ref[...], preferred_element_type=jnp.float32
    )

    @pl.when(k == pl.num_programs(2) - 1)
    def _finalize():
        # Bias added exactly once, as a lane-dense (1, tn) row broadcast over
        # the batch sublanes of the (tm, tn) output tile.
        o_ref[...] = (acc_ref[...] + b_ref[...]).astype(o_ref.dtype)


@functools.partial(jax.jit, static_argnames=("tm", "tn", "tk"))
def linear_forward(w, b, x, *, tm=256, tn=256, tk=512):
    """y = w @ x + b.   w: (O, I), b: (O, 1), x: (I, N)  ->  (O, N)."""
    out_features, in_features = w.shape
    n = x.shape[1]

    # Layout plumbing: transposed problem so out_features is the lane axis.
    xt = x.T                                   # (N, I)
    wt = w.T                                   # (I, O)
    brow = b.reshape(1, out_features)          # (1, O)

    # Per-problem tile sizes, clamped for small shapes, (8, 128)-aligned.
    # Defaults (256, 256, 512) keep live VMEM ~a few MiB with double-buffering:
    # safe on v7x's 64 MiB physical VMEM and a good MXU-feeding size on v5e/v6e.
    tm = min(tm, _round_up(n, 8))
    tn = min(tn, _round_up(out_features, 128))
    tk = min(tk, _round_up(in_features, 128))

    mp = _round_up(n, tm)
    np_ = _round_up(out_features, tn)
    kp = _round_up(in_features, tk)

    if (mp, kp) != xt.shape:
        xt = jnp.pad(xt, ((0, mp - n), (0, kp - in_features)))
    if (kp, np_) != wt.shape:
        wt = jnp.pad(wt, ((0, kp - in_features), (0, np_ - out_features)))
    if np_ != out_features:
        brow = jnp.pad(brow, ((0, 0), (0, np_ - out_features)))

    grid = (mp // tm, np_ // tn, kp // tk)

    flops = 2 * n * in_features * out_features
    bytes_accessed = 4 * (
        n * in_features + in_features * out_features + n * out_features + out_features
    )

    # TODO(synk): optionally cast xt/wt to bfloat16 here (keeping the f32
    # accumulator) for a large MXU/HBM win when accuracy permits; kept f32 to
    # match the original module's numerics.
    yt = pl.pallas_call(
        _linear_kernel,
        out_shape=jax.ShapeDtypeStruct((mp, np_), jnp.float32),
        grid_spec=pltpu.PrefetchScalarGridSpec(
            num_scalar_prefetch=0,
            grid=grid,
            in_specs=[
                pl.BlockSpec((tm, tk), lambda i, j, k: (i, k)),  # x.T tile
                pl.BlockSpec((tk, tn), lambda i, j, k: (k, j)),  # w.T tile
                pl.BlockSpec((1, tn), lambda i, j, k: (0, j)),   # bias row, K-invariant
            ],
            out_specs=pl.BlockSpec((tm, tn), lambda i, j, k: (i, j)),
            scratch_shapes=[pltpu.VMEM((tm, tn), jnp.float32)],
        ),
        compiler_params=pltpu.CompilerParams(
            dimension_semantics=("parallel", "parallel", "arbitrary"),
            vmem_limit_bytes=32 * 1024 * 1024,
        ),
        cost_estimate=pl.CostEstimate(
            flops=flops, transcendentals=0, bytes_accessed=bytes_accessed
        ),
    )(xt, wt, brow)

    # Strip padding and return in the module's (O, N) layout.
    return yt[:n, :out_features].T


class Linear:
    """JAX/Pallas port of the PyTorch `Linear` module (forward only)."""

    def __init__(self, in_features, out_features, gamma=0.001, key=None):
        if key is None:
            key = jax.random.PRNGKey(0)
        kw, kb = jax.random.split(key)
        self.gamma = gamma
        # torch.empty(...).normal_() -> standard normal init, deterministic here.
        self.w = jax.random.normal(kw, (out_features, in_features), dtype=jnp.float32)
        self.b = jax.random.normal(kb, (out_features, 1), dtype=jnp.float32)
        self.dl_dw = None
        self.dl_db = None

    def forward(self, x):
        self.x = x
        return linear_forward(self.w, self.b, x)

    # TODO(synk): backward (SGD-in-place parameter update) is stateful training
    # logic, not part of the forward-pass kernel.

    def param(self):
        return [[self.w, self.dl_dw], [self.b, self.dl_db]]


if __name__ == "__main__":
    key = jax.random.PRNGKey(0)
    k_layer, k_x, k_layer2, k_x2 = jax.random.split(key, 4)

    # --- Small test (matches the module's intended tiny-MLP usage) ---
    in_features, out_features, batch = 32, 16, 8
    layer = Linear(in_features, out_features, key=k_layer)
    x = jax.random.normal(k_x, (in_features, batch), dtype=jnp.float32)

    y = jax.block_until_ready(layer.forward(x))
    y_ref = layer.w @ x + layer.b
    assert y.shape == (out_features, batch)
    assert jnp.allclose(y, y_ref, atol=1e-4, rtol=1e-4)

    # --- Moderate test that exercises the tiled (M, N, K) grid + K accumulation ---
    in2, out2, batch2 = 1024, 512, 64
    layer2 = Linear(in2, out2, key=k_layer2)
    x2 = jax.random.normal(k_x2, (in2, batch2), dtype=jnp.float32)

    y2 = jax.block_until_ready(layer2.forward(x2))
    y2_ref = layer2.w @ x2 + layer2.b
    assert y2.shape == (out2, batch2)
    max_err = jnp.max(jnp.abs(y2 - y2_ref))
    assert max_err < 1e-2, f"max abs err {max_err}"

    print("KERNEL_OK")
</pallas_src>

<mosaic_0001>
module attributes {stable_mosaic.version = 11 : i64} {
  func.func @_linear_kernel(%arg0: i32, %arg1: i32, %arg2: i32, %arg3: memref<8x128xf32, #tpu.memory_space<vmem>>, %arg4: memref<128x128xf32, #tpu.memory_space<vmem>>, %arg5: memref<1x128xf32, #tpu.memory_space<vmem>>, %arg6: memref<8x128xf32, #tpu.memory_space<vmem>>, %arg7: memref<8x128xf32, #tpu.memory_space<vmem>>) attributes {dimension_semantics = [#tpu.dimension_semantics<parallel>, #tpu.dimension_semantics<parallel>, #tpu.dimension_semantics<arbitrary>], iteration_bounds = array<i64: 1, 1, 1>, scalar_prefetch = 0 : i64, scratch_operands = 1 : i64, tpu.core_type = #tpu.core_type<tc>, window_params = [{transform_indices = @transform_0, window_bounds = array<i64: 8, 128>}, {transform_indices = @transform_1, window_bounds = array<i64: 128, 128>}, {transform_indices = @transform_2, window_bounds = array<i64: 1, 128>}, {transform_indices = @transform_3, window_bounds = array<i64: 8, 128>}]} {
    %c0_i32 = arith.constant 0 : i32
    %0 = arith.cmpi eq, %arg2, %c0_i32 : i32
    %1 = arith.extui %0 : i1 to i32
    %c0_i32_0 = arith.constant 0 : i32
    %2 = arith.cmpi ne, %1, %c0_i32_0 : i32
    scf.if %2 {
      %cst_10 = arith.constant 0.000000e+00 : f32
      %12 = vector.broadcast %cst_10 : f32 to vector<8x128xf32>
      %c0_11 = arith.constant 0 : index
      %c0_12 = arith.constant 0 : index
      %13 = vector.load %arg7[%c0_11, %c0_12] : memref<8x128xf32, #tpu.memory_space<vmem>>, vector<8x128xf32>
      tpu.vector_store %arg7[%c0_11, %c0_12], %12 {strides = array<i32>} : memref<8x128xf32, #tpu.memory_space<vmem>>, vector<8x128xf32>,
    } else {
    }
    %c0 = arith.constant 0 : index
    %c0_1 = arith.constant 0 : index
    %3 = vector.load %arg7[%c0, %c0_1] : memref<8x128xf32, #tpu.memory_space<vmem>>, vector<8x128xf32>
    %c0_2 = arith.constant 0 : index
    %c0_3 = arith.constant 0 : index
    %4 = vector.load %arg3[%c0_2, %c0_3] : memref<8x128xf32, #tpu.memory_space<vmem>>, vector<8x128xf32>
    %c0_4 = arith.constant 0 : index
    %c0_5 = arith.constant 0 : index
    %5 = vector.load %arg4[%c0_4, %c0_5] : memref<128x128xf32, #tpu.memory_space<vmem>>, vector<128x128xf32>
    %cst = arith.constant dense<0.000000e+00> : vector<8x128xf32>
    %6 = tpu.matmul %4, %5, %cst {dimension_numbers = #tpu.dot_dimension_numbers<[1], [0], [0], [1], [0, 0, 1, 1], [], []>} : vector<8x128xf32>, vector<128x128xf32>, vector<8x128xf32> -> vector<8x128xf32>
    %7 = arith.addf %3, %6 : vector<8x128xf32>
    %c0_6 = arith.constant 0 : index
    %c0_7 = arith.constant 0 : index
    %8 = vector.load %arg7[%c0_6, %c0_7] : memref<8x128xf32, #tpu.memory_space<vmem>>, vector<8x128xf32>
    tpu.vector_store %arg7[%c0_6, %c0_7], %7 {strides = array<i32>} : memref<8x128xf32, #tpu.memory_space<vmem>>, vector<8x128xf32>,
    %c0_i32_8 = arith.constant 0 : i32
    %9 = arith.cmpi eq, %arg2, %c0_i32_8 : i32
    %10 = arith.extui %9 : i1 to i32
    %c0_i32_9 = arith.constant 0 : i32
    %11 = arith.cmpi ne, %10, %c0_i32_9 : i32
    scf.if %11 {
      %c0_10 = arith.constant 0 : index
      %c0_11 = arith.constant 0 : index
      %12 = vector.load %arg7[%c0_10, %c0_11] : memref<8x128xf32, #tpu.memory_space<vmem>>, vector<8x128xf32>
      %c0_12 = arith.constant 0 : index
      %c0_13 = arith.constant 0 : index
      %13 = vector.load %arg5[%c0_12, %c0_13] : memref<1x128xf32, #tpu.memory_space<vmem>>, vector<1x128xf32>
      %14 = vector.broadcast %13 : vector<1x128xf32> to vector<8x128xf32>
      %15 = arith.addf %12, %14 : vector<8x128xf32>
      %c0_14 = arith.constant 0 : index
      %c0_15 = arith.constant 0 : index
      %16 = vector.load %arg6[%c0_14, %c0_15] : memref<8x128xf32, #tpu.memory_space<vmem>>, vector<8x128xf32>
      tpu.vector_store %arg6[%c0_14, %c0_15], %15 {strides = array<i32>} : memref<8x128xf32, #tpu.memory_space<vmem>>, vector<8x128xf32>,
    } else {
    }
    return
  }
  func.func @transform_0(%arg0: i32, %arg1: i32, %arg2: i32) -> (i32, i32) {
    %c0_i32 = arith.constant 0 : i32
    return %arg0, %arg2 : i32, i32
  }
  func.func @transform_1(%arg0: i32, %arg1: i32, %arg2: i32) -> (i32, i32) {
    %c0_i32 = arith.constant 0 : i32
    return %arg2, %arg1 : i32, i32
  }
  func.func @transform_2(%arg0: i32, %arg1: i32, %arg2: i32) -> (i32, i32) {
    %c0_i32 = arith.constant 0 : i32
    %c0_i32_0 = arith.constant 0 : i32
    return %c0_i32, %arg1 : i32, i32
  }
  func.func @transform_3(%arg0: i32, %arg1: i32, %arg2: i32) -> (i32, i32) {
    %c0_i32 = arith.constant 0 : i32
    return %arg0, %arg1 : i32, i32
  }
}

</mosaic_0001>

<bundles_post_ra>
// kernel: linear_forward.1
= control target key start
LH: loop header
LB: loop body
LE: loop exit
PB: predicated region body
PF: predicated region fallthrough
CT: control target
= control target key end

     0   :  { %v206_v0 = vmov 0.0|0.0   ;;  %vm207_vm0 = vmmov 0   ;;  %v208_v4 = vmov 0.0   ;;  %s286_s1 = inlined_call_operand.vmem [shape: f32[128,128], index: 1, kind: input, shape index: {}]   ;;  %s287_s0 = inlined_call_operand.vmem [shape: f32[8,128], index: 0, kind: input, shape index: {}]   ;;  %s288_s2 = inlined_call_operand.vmem [shape: f32[1,128], index: 2, kind: input, shape index: {}]   ;;  %s289_s3 = inlined_call_operand.vmem [shape: f32[8,128], index: 3, kind: output, shape index: {}]  }
   0x1   :  { %179 = vmatprep.subr.bf16.mxu0 %v206_v0  ;;  %v21_v1 = vld [vmem:[%s286_s1] sm:$0xff]  ;;  %v22_v2 = vld [vmem:[%s286_s1 + $0x8] sm:$0xff]  ;;  %v23_v3 = vld [vmem:[%s286_s1 + $0x10] sm:$0xff]  ;;  %176 = vmatprep.mubr.msk.f32.mxu0 %vm207_vm0, %v208_v4 }
   0x2   :  { %v180_v5 = vpack.c.bf16 %v22_v2, %v21_v1  ;;  %v24_v6 = vld [vmem:[%s286_s1 + $0x18] sm:$0xff]  ;;  %v25_v8 = vld [vmem:[%s286_s1 + $0x20] sm:$0xff]  ;;  %v26_v9 = vld [vmem:[%s286_s1 + $0x28] sm:$0xff] }
   0x3   :  { %v183_v7 = vpack.c.bf16 %v24_v6, %v23_v3  ;;  %v186_v10 = vpack.c.bf16 %v26_v9, %v25_v8  ;;  %v27_v11 = vld [vmem:[%s286_s1 + $0x30] sm:$0xff]  ;;  %v28_v12 = vld [vmem:[%s286_s1 + $0x38] sm:$0xff]  ;;  %v29_v14 = vld [vmem:[%s286_s1 + $0x40] sm:$0xff] }
   0x4   :  { %181 = vmatpush3.bf16.msra.mxu0 %v180_v5  ;;  %v189_v13 = vpack.c.bf16 %v28_v12, %v27_v11  ;;  %v30_v15 = vld [vmem:[%s286_s1 + $0x48] sm:$0xff]  ;;  %v31_v17 = vld [vmem:[%s286_s1 + $0x50] sm:$0xff]  ;;  %v32_v18 = vld [vmem:[%s286_s1 + $0x58] sm:$0xff] }
   0x5   :  { %182 = vmatprep.subr.bf16.mxu0 %v206_v0  ;;  %v192_v16 = vpack.c.bf16 %v30_v15, %v29_v14  ;;  %v195_v19 = vpack.c.bf16 %v32_v18, %v31_v17  ;;  %v33_v20 = vld [vmem:[%s286_s1 + $0x60] sm:$0xff]  ;;  %v34_v21 = vld [vmem:[%s286_s1 + $0x68] sm:$0xff]  ;;  %v35_v23 = vld [vmem:[%s286_s1 + $0x70] sm:$0xff] }
   0x6   :  { %v198_v22 = vpack.c.bf16 %v34_v21, %v33_v20  ;;  %v36_v24 = vld [vmem:[%s286_s1 + $0x78] sm:$0xff]  ;;  %v20_v26 = vld [vmem:[%s287_s0] sm:$0xff] }
   0x7   :  { %v201_v25 = vpack.c.bf16 %v36_v24, %v35_v23  ;;  %v126_v27 = vld [vmem:[%s288_s2] ss:$0 sm:$0xff] }
   0x8   :  { %184 = vmatpush3.bf16.msra.mxu0 %v183_v7 }
   0x9   :  { %185 = vmatprep.subr.bf16.mxu0 %v206_v0 }
   0xc   :  { %187 = vmatpush3.bf16.msra.mxu0 %v186_v10 }
   0xd   :  { %188 = vmatprep.subr.bf16.mxu0 %v206_v0 }
  0x10   :  { %190 = vmatpush3.bf16.msra.mxu0 %v189_v13 }
  0x11   :  { %191 = vmatprep.subr.bf16.mxu0 %v206_v0 }
  0x14   :  { %193 = vmatpush3.bf16.msra.mxu0 %v192_v16 }
  0x15   :  { %194 = vmatprep.subr.bf16.mxu0 %v206_v0 }
  0x18   :  { %196 = vmatpush3.bf16.msra.mxu0 %v195_v19 }
  0x19   :  { %197 = vmatprep.subr.bf16.mxu0 %v206_v0 }
  0x1c   :  { %199 = vmatpush3.bf16.msra.mxu0 %v198_v22 }
  0x1d   :  { %200 = vmatprep.subr.bf16.mxu0 %v206_v0 }
  0x20   :  { %202 = vmatpush3.bf16.msra.mxu0 %v201_v25 }
  0x23   :  { %177 = vmatmul.mubr.f32.vlgmr.msra.gmra.mrb[0].mxu0 %v20_v26 }
  0xf6   :  { %v103_v28 = vpop.f32.mrb[0].mxu0 }
  0xf7   :  { %v120_v29 = vadd.f32 %v126_v27, %v103_v28  ;;  %v178_v30 = vpop.f32.mrb[1].mxu0 }
  0xf9   :  { %121 = vst [vmem:[%s289_s3] sm:$0xff] %v120_v29 }

</bundles_post_ra>
